<compile_context>
chip_gen: v7x
topology: tpu7x:2x2x1
jax: 0.10.0
libtpu: 0.0.40
codegen_flags: <defaults>
</compile_context>

<pallas_src>
import functools

import jax
import jax.numpy as jnp
import numpy as np
from jax.experimental import pallas as pl
from jax.experimental.pallas import tpu as pltpu


def _round_up(x, m):
    return ((x + m - 1) // m) * m


# ----------------------------------------------------------------------------
# Kernel
# ----------------------------------------------------------------------------
def _kernel(x_ref, iota_ref, c_ref, m_ref, out_ref):
    """One batch tile -> one fused MXU pass producing the post-embedding slab."""
    xv = x_ref[...]                                               # (TB, F) f32

    # Broadcast every categorical code across its one-hot block with ONE tiny
    # matmul against a static 0/1 matrix (no per-feature lane slices / concat
    # chains burning XLU + relayout cycles).
    code_bcast = jnp.dot(xv, c_ref[...], preferred_element_type=jnp.float32)

    # Lane-aligned compare against the host-precomputed local-iota row
    # (truncation toward zero via int32 cast mirrors .long()).
    one_hot = (iota_ref[...] == code_bcast.astype(jnp.int32)).astype(jnp.float32)

    # [one_hot | x] @ [[W],[S]]: categorical embeddings + continuous
    # passthrough in a single matmul (combined K is tiny), single dense store.
    feats = jnp.concatenate([one_hot, xv], axis=1)                # (TB, Wc+F)
    out_ref[...] = jnp.dot(feats, m_ref[...], preferred_element_type=jnp.float32)


# ----------------------------------------------------------------------------
# Host-side weight construction
# ----------------------------------------------------------------------------
def build_projection_matrices(input_dim, cat_idxs, cat_dims, cat_emb_dims,
                              tables_np):
    """Builds the fused projection for the EmbeddingGenerator forward.

    Returns
      M    : (n_cat*max_cat_dim_pad + input_dim, post_embed_dim)
             top block rows = embedding tables scattered to their output
             columns; bottom input_dim rows = 0/1 selection of continuous cols.
      C    : (input_dim, n_cat*max_cat_dim_pad)  0/1 code-broadcast matrix.
      iota : (1, n_cat*max_cat_dim_pad) int32   local row index per block.
      post_embed_dim, max_cat_dim_pad
    """
    n_cat = len(cat_idxs)
    post_embed_dim = int(input_dim + np.sum(cat_emb_dims) - len(cat_emb_dims))
    max_cat_dim_pad = _round_up(max(cat_dims), 8)
    wc = n_cat * max_cat_dim_pad

    M = np.zeros((wc + input_dim, post_embed_dim), np.float32)
    C = np.zeros((input_dim, wc), np.float32)
    iota = np.tile(np.arange(max_cat_dim_pad, dtype=np.int32), n_cat)[None, :]

    cat_pos = {int(c): j for j, c in enumerate(cat_idxs)}
    p = 0
    for f in range(input_dim):
        if f in cat_pos:
            j = cat_pos[f]
            d, e = cat_dims[j], cat_emb_dims[j]
            r0 = j * max_cat_dim_pad
            M[r0:r0 + d, p:p + e] = np.asarray(tables_np[j], np.float32)
            C[f, r0:r0 + max_cat_dim_pad] = 1.0
            p += e
        else:
            M[wc + f, p] = 1.0
            p += 1
    assert p == post_embed_dim
    return (jnp.asarray(M), jnp.asarray(C), jnp.asarray(iota),
            post_embed_dim, max_cat_dim_pad)


# ----------------------------------------------------------------------------
# pallas_call wrapper
# ----------------------------------------------------------------------------
def _probe_kernel(x_ref, o_ref):
    o_ref[...] = x_ref[...]


@functools.lru_cache(maxsize=None)
def _single_buffer_weights_supported():
    """One-time probe: does this JAX/Mosaic accept pipeline_mode=Buffered(1)?"""
    try:
        out = pl.pallas_call(
            _probe_kernel,
            out_shape=jax.ShapeDtypeStruct((8, 128), jnp.float32),
            grid=(1,),
            in_specs=[pl.BlockSpec((8, 128), lambda i: (0, 0),
                                   pipeline_mode=pl.Buffered(1))],
            out_specs=pl.BlockSpec((8, 128), lambda i: (0, 0)),
        )(jnp.zeros((8, 128), jnp.float32))
        jax.block_until_ready(out)
        return True
    except Exception:
        return False


def _resident_spec(shape, single_buffer):
    # Grid-invariant input: constant index_map; single-buffer if supported.
    kwargs = {"pipeline_mode": pl.Buffered(1)} if single_buffer else {}
    return pl.BlockSpec(shape, lambda i: (0,) * len(shape), **kwargs)


def embedding_generator_forward(x, M, C, iota_row, *, post_embed_dim,
                                block_batch=1024):
    """x: (B, input_dim) float32 -> (B, post_embed_dim) float32.

    No wrapper-side padding/slicing: cdiv grid + ragged-last-block masking, and
    the output is produced at its final (B, post_embed_dim) shape directly.
    For the skip_embedding case (no categorical features) the forward is the
    identity and this function should not be called.
    """
    B, input_dim = x.shape
    wc = C.shape[1]
    k_rows = M.shape[0]

    # VMEM-aware batch tile: biggest multiple of 8 that keeps the double-
    # buffered x/out tiles (lane-padded) plus the resident weights inside a
    # budget that still leaves headroom on v7x's 64 MiB VMEM.
    resident_bytes = 4 * (
        _round_up(1, 8) * _round_up(wc, 128)
        + _round_up(input_dim, 8) * _round_up(wc, 128)
        + _round_up(k_rows, 8) * _round_up(post_embed_dim, 128))
    row_bytes = 4 * 2 * (_round_up(input_dim, 128) + _round_up(post_embed_dim, 128))
    budget = 40 * 1024 * 1024
    tb_cap = max(8, ((budget - 2 * resident_bytes) // row_bytes) // 8 * 8)

    if B <= min(block_batch, tb_cap):
        TB = B                                  # one full-array block (any B)
    else:
        TB = max(8, (min(block_batch, tb_cap) // 8) * 8)
    grid = (pl.cdiv(B, TB),)

    cost = pl.CostEstimate(
        flops=2 * B * (input_dim * wc + k_rows * post_embed_dim),
        transcendentals=0,
        bytes_accessed=4 * (B * input_dim + wc + input_dim * wc
                            + k_rows * post_embed_dim + B * post_embed_dim),
    )

    single_buffer = _single_buffer_weights_supported()
    return pl.pallas_call(
        _kernel,
        out_shape=jax.ShapeDtypeStruct((B, post_embed_dim), jnp.float32),
        grid=grid,
        in_specs=[
            pl.BlockSpec((TB, input_dim), lambda i: (i, 0)),
            _resident_spec((1, wc), single_buffer),
            _resident_spec((input_dim, wc), single_buffer),
            _resident_spec((k_rows, post_embed_dim), single_buffer),
        ],
        out_specs=pl.BlockSpec((TB, post_embed_dim), lambda i: (i, 0)),
        compiler_params=pltpu.CompilerParams(
            dimension_semantics=("parallel",),       # megacore split on v7x
            vmem_limit_bytes=48 * 1024 * 1024,       # safe on v5e/v6e/v7x
        ),
        cost_estimate=cost,
    )(x, iota_row, C, M)


# ----------------------------------------------------------------------------
# Pure-JAX reference (replicates the PyTorch forward column-wise concat)
# ----------------------------------------------------------------------------
def _reference_forward(x, tables, input_dim, cat_idxs):
    cat_set = set(cat_idxs)
    cat_order = {idx: j for j, idx in enumerate(cat_idxs)}
    cols = []
    for f in range(input_dim):
        if f in cat_set:
            idx = x[:, f].astype(jnp.int32)
            cols.append(tables[cat_order[f]][idx])
        else:
            cols.append(x[:, f:f + 1])
    return jnp.concatenate(cols, axis=1)


if __name__ == "__main__":
    # Module configuration (small, consistent with the PyTorch __init__).
    input_dim = 8
    cat_idxs = [1, 4, 6]
    cat_dims = [5, 7, 3]
    cat_emb_dims = [4, 3, 2]
    batch = 24            # TB=16 -> 2 grid steps incl. a ragged last block

    key = jax.random.PRNGKey(0)
    k_x, k_cat, *k_emb = jax.random.split(key, 2 + len(cat_dims))

    # Deterministic embedding tables (torch.nn.Embedding default ~ N(0, 1)).
    tables = [
        jax.random.normal(k_emb[j], (cat_dims[j], cat_emb_dims[j]), dtype=jnp.float32)
        for j in range(len(cat_dims))
    ]

    M, C, iota_row, post_embed_dim, max_cat_dim_pad = build_projection_matrices(
        input_dim, cat_idxs, cat_dims, cat_emb_dims,
        [np.asarray(t) for t in tables])
    assert post_embed_dim == int(input_dim + np.sum(cat_emb_dims) - len(cat_emb_dims))

    # Inputs: continuous columns ~ N(0,1); categorical columns hold int codes.
    x = jax.random.normal(k_x, (batch, input_dim), dtype=jnp.float32)
    for j, ci in enumerate(cat_idxs):
        codes = jax.random.randint(jax.random.fold_in(k_cat, j), (batch,), 0, cat_dims[j])
        x = x.at[:, ci].set(codes.astype(jnp.float32))

    # block_batch=16 only to exercise multi-step pipelining + ragged masking at
    # this tiny demo size; production callers keep the default (1024).
    out = embedding_generator_forward(
        x, M, C, iota_row, post_embed_dim=post_embed_dim, block_batch=16)
    out = jax.block_until_ready(out)

    ref = _reference_forward(x, tables, input_dim, cat_idxs)
    assert out.shape == (batch, post_embed_dim), out.shape
    np.testing.assert_allclose(np.asarray(out), np.asarray(ref), rtol=1e-6, atol=1e-6)

    print("KERNEL_OK")
</pallas_src>

<mosaic_0001>
module attributes {stable_mosaic.version = 11 : i64} {
  func.func @_probe_kernel(%arg0: i32, %arg1: memref<8x128xf32, #tpu.memory_space<vmem>>, %arg2: memref<8x128xf32, #tpu.memory_space<vmem>>) attributes {dimension_semantics = [#tpu.dimension_semantics<arbitrary>], iteration_bounds = array<i64: 1>, scalar_prefetch = 0 : i64, scratch_operands = 0 : i64, tpu.core_type = #tpu.core_type<tc>, window_params = [{pipeline_mode = #tpu.pipeline_mode<synchronous>, transform_indices = @transform_0, window_bounds = array<i64: 8, 128>}, {pipeline_mode = #tpu.pipeline_mode<synchronous>, transform_indices = @transform_1, window_bounds = array<i64: 8, 128>}]} {
    %c0 = arith.constant 0 : index
    %c0_0 = arith.constant 0 : index
    %0 = vector.load %arg1[%c0, %c0_0] : memref<8x128xf32, #tpu.memory_space<vmem>>, vector<8x128xf32>
    %c0_1 = arith.constant 0 : index
    %c0_2 = arith.constant 0 : index
    %1 = vector.load %arg2[%c0_1, %c0_2] : memref<8x128xf32, #tpu.memory_space<vmem>>, vector<8x128xf32>
    tpu.vector_store %arg2[%c0_1, %c0_2], %0 {strides = array<i32>} : memref<8x128xf32, #tpu.memory_space<vmem>>, vector<8x128xf32>,
    return
  }
  func.func @transform_0(%arg0: i32) -> (i32, i32) {
    %c0_i32 = arith.constant 0 : i32
    %c0_i32_0 = arith.constant 0 : i32
    %c0_i32_1 = arith.constant 0 : i32
    return %c0_i32, %c0_i32_0 : i32, i32
  }
  func.func @transform_1(%arg0: i32) -> (i32, i32) {
    %c0_i32 = arith.constant 0 : i32
    %c0_i32_0 = arith.constant 0 : i32
    %c0_i32_1 = arith.constant 0 : i32
    return %c0_i32, %c0_i32_0 : i32, i32
  }
}

module attributes {stable_mosaic.version = 11 : i64} {
  func.func @_kernel(%arg0: i32, %arg1: memref<16x8xf32, #tpu.memory_space<vmem>>, %arg2: memref<1x24xi32, #tpu.memory_space<vmem>>, %arg3: memref<8x24xf32, #tpu.memory_space<vmem>>, %arg4: memref<32x14xf32, #tpu.memory_space<vmem>>, %arg5: memref<16x14xf32, #tpu.memory_space<vmem>>) attributes {dimension_semantics = [#tpu.dimension_semantics<parallel>], iteration_bounds = array<i64: 2>, scalar_prefetch = 0 : i64, scratch_operands = 0 : i64, tpu.core_type = #tpu.core_type<tc>, window_params = [{transform_indices = @transform_0, window_bounds = array<i64: 16, 8>}, {pipeline_mode = #tpu.pipeline_mode<synchronous>, transform_indices = @transform_1, window_bounds = array<i64: 1, 24>}, {pipeline_mode = #tpu.pipeline_mode<synchronous>, transform_indices = @transform_2, window_bounds = array<i64: 8, 24>}, {pipeline_mode = #tpu.pipeline_mode<synchronous>, transform_indices = @transform_3, window_bounds = array<i64: 32, 14>}, {transform_indices = @transform_4, window_bounds = array<i64: 16, 14>}]} {
    %c0 = arith.constant 0 : index
    %c0_0 = arith.constant 0 : index
    %0 = vector.load %arg1[%c0, %c0_0] : memref<16x8xf32, #tpu.memory_space<vmem>>, vector<16x8xf32>
    %c0_1 = arith.constant 0 : index
    %c0_2 = arith.constant 0 : index
    %1 = vector.load %arg3[%c0_1, %c0_2] : memref<8x24xf32, #tpu.memory_space<vmem>>, vector<8x24xf32>
    %cst = arith.constant dense<0.000000e+00> : vector<16x24xf32>
    %2 = tpu.matmul %0, %1, %cst {dimension_numbers = #tpu.dot_dimension_numbers<[1], [0], [0], [1], [0, 0, 1, 1], [], []>} : vector<16x8xf32>, vector<8x24xf32>, vector<16x24xf32> -> vector<16x24xf32>
    %c0_3 = arith.constant 0 : index
    %c0_4 = arith.constant 0 : index
    %3 = vector.load %arg2[%c0_3, %c0_4] : memref<1x24xi32, #tpu.memory_space<vmem>>, vector<1x24xi32>
    %4 = arith.fptosi %2 : vector<16x24xf32> to vector<16x24xi32>
    %5 = vector.broadcast %3 : vector<1x24xi32> to vector<16x24xi32>
    %6 = arith.cmpi eq, %5, %4 : vector<16x24xi32>
    %7 = arith.extui %6 : vector<16x24xi1> to vector<16x24xi32>
    %8 = arith.sitofp %7 : vector<16x24xi32> to vector<16x24xf32>
    %9 = tpu.concatenate %8, %0 in 1 : vector<16x24xf32>, vector<16x8xf32> -> vector<16x32xf32>
    %c0_5 = arith.constant 0 : index
    %c0_6 = arith.constant 0 : index
    %10 = vector.load %arg4[%c0_5, %c0_6] : memref<32x14xf32, #tpu.memory_space<vmem>>, vector<32x14xf32>
    %cst_7 = arith.constant dense<0.000000e+00> : vector<16x14xf32>
    %11 = tpu.matmul %9, %10, %cst_7 {dimension_numbers = #tpu.dot_dimension_numbers<[1], [0], [0], [1], [0, 0, 1, 1], [], []>} : vector<16x32xf32>, vector<32x14xf32>, vector<16x14xf32> -> vector<16x14xf32>
    %c0_8 = arith.constant 0 : index
    %c0_9 = arith.constant 0 : index
    %12 = vector.load %arg5[%c0_8, %c0_9] : memref<16x14xf32, #tpu.memory_space<vmem>>, vector<16x14xf32>
    tpu.vector_store %arg5[%c0_8, %c0_9], %11 {strides = array<i32>} : memref<16x14xf32, #tpu.memory_space<vmem>>, vector<16x14xf32>,
    return
  }
  func.func @transform_0(%arg0: i32) -> (i32, i32) {
    %c0_i32 = arith.constant 0 : i32
    %c0_i32_0 = arith.constant 0 : i32
    return %arg0, %c0_i32 : i32, i32
  }
  func.func @transform_1(%arg0: i32) -> (i32, i32) {
    %c0_i32 = arith.constant 0 : i32
    %c0_i32_0 = arith.constant 0 : i32
    %c0_i32_1 = arith.constant 0 : i32
    return %c0_i32, %c0_i32_0 : i32, i32
  }
  func.func @transform_2(%arg0: i32) -> (i32, i32) {
    %c0_i32 = arith.constant 0 : i32
    %c0_i32_0 = arith.constant 0 : i32
    %c0_i32_1 = arith.constant 0 : i32
    return %c0_i32, %c0_i32_0 : i32, i32
  }
  func.func @transform_3(%arg0: i32) -> (i32, i32) {
    %c0_i32 = arith.constant 0 : i32
    %c0_i32_0 = arith.constant 0 : i32
    %c0_i32_1 = arith.constant 0 : i32
    return %c0_i32, %c0_i32_0 : i32, i32
  }
  func.func @transform_4(%arg0: i32) -> (i32, i32) {
    %c0_i32 = arith.constant 0 : i32
    %c0_i32_0 = arith.constant 0 : i32
    return %arg0, %c0_i32 : i32, i32
  }
}

</mosaic_0001>

<bundles_post_ra>
// kernel: tpu_custom_call.1
= control target key start
LH: loop header
LB: loop body
LE: loop exit
PB: predicated region body
PF: predicated region fallthrough
CT: control target
= control target key end

     0   :  { %6 = vsyncpa [#allocation3], 0  ;;  %s124_s0 = inlined_call_operand.hbm [shape: f32[8,128], index: 0, kind: input, shape index: {}]   ;;  %s125_s1 = inlined_call_operand.hbm [shape: f32[8,128], index: 1, kind: output, shape index: {}]  }
   0x1   :  { %7 = vsyncpa [#allocation4], 0  ;;  %s88_s6 = smov [#allocation2]   ;;  %s40_s10 = scalar_lea.hbm %s124_s0, 128 }
   0x2   :  { %s14_s7 = sshll.u32 %s88_s6, 4  ;;  %p41_p0 = scmp.ne.s32.totalorder %s124_s0, %s40_s10  ;;  %s15_s7 = int_to_ptr.vmem [resolvable:$true] %s14_s7 }
   0x3   :  { %p44_p1 = scmp.lt.u32.totalorder %s40_s10, %s124_s0 }
   0x5   :  { %p46_p2 = pnand %p44_p1, %p41_p0 }
   0x7   :  { %49 = shalt.err (!%p46_p2)
}
   0x8   :  { %s50_s15 = scalar_lea.vmem %s15_s7, 128  ;;  %p55_p4 = scmp.lt.s32.totalorder %s15_s7, %s15_s7 }
   0x9   :  { %p51_p3 = scmp.ne.s32.totalorder %s15_s7, %s50_s15  ;;  %p56_p5 = scmp.lt.s32.totalorder %s50_s15, %s50_s15 }
   0xb   :  { %p57_p6 = por %p56_p5, %p55_p4 }
   0xd   :  { %p58_p7 = pnand %p57_p6, %p51_p3 }
   0xf   :  { %61 = shalt.err (!%p58_p7)
}
  0x10   :  { %17 = dma.hbm_to_vmem [thread:$0]  %s124_s0, 128, %s15_s7, [#allocation3]  }
  0x11   :  { %84 = dma.done.wait [#allocation3], 128  }
  0x12   :  { %85 = vsyncadd [#allocation3], 4294967168  ;;  %s89_s18 = smov [#allocation5]   ;;  %v21_v0 = vld [vmem:[#allocation2] sm:$0xff] }
  0x13   :  { %s29_s19 = sshll.u32 %s89_s18, 4  ;;  %22 = vst [vmem:[#allocation5] sm:$0xff] %v21_v0  ;;  %s30_s19 = int_to_ptr.vmem [resolvable:$true] %s29_s19 }
  0x14   :  { %s62_s20 = scalar_lea.vmem %s30_s19, 128  ;;  %p67_p9 = scmp.lt.s32.totalorder %s30_s19, %s30_s19 }
  0x15   :  { %p63_p8 = scmp.ne.s32.totalorder %s30_s19, %s62_s20  ;;  %p68_p10 = scmp.lt.s32.totalorder %s62_s20, %s62_s20 }
  0x17   :  { %p69_p11 = por %p68_p10, %p67_p9 }
  0x19   :  { %p70_p12 = pnand %p69_p11, %p63_p8 }
  0x1b   :  { %73 = shalt.err (!%p70_p12)
}
  0x1c   :  { %s74_s23 = scalar_lea.hbm %s125_s1, 128 }
  0x1d   :  { %p75_p13 = scmp.ne.s32.totalorder %s125_s1, %s74_s23  ;;  %p78_p0 = scmp.lt.u32.totalorder %s74_s23, %s125_s1 }
  0x1f   :  { %p80_p1 = pnand %p78_p0, %p75_p13 }
  0x21   :  { %83 = shalt.err (!%p80_p1)
}
  0x22   :  { %32 = dma.vmem_to_hbm [thread:$0]  %s30_s19, 128, %s125_s1, [#allocation4]  }
  0x23   :  { %86 = dma.done.wait [#allocation4], 128  }
  0x24   :  { %87 = vsyncadd [#allocation4], 4294967168 }
  0x25   :  { %36 = vsyncpa [#allocation3], 1 }
  0x26   :  { %37 = vsyncpa [#allocation4], 1 }

// kernel: tpu_custom_call.1
= control target key start
LH: loop header
LB: loop body
LE: loop exit
PB: predicated region body
PF: predicated region fallthrough
CT: control target
= control target key end

     0   :  { %s910_s15 = smov 0   ;;  %s912_s16 = smov 0   ;;  %s1011_s0 = inlined_call_operand.vmem [shape: f32[24,8], index: 0, kind: input, shape index: {}]   ;;  %s1012_s1 = inlined_call_operand.vmem [shape: s32[1,24], index: 1, kind: input, shape index: {}]   ;;  %s1013_s2 = inlined_call_operand.vmem [shape: f32[8,24], index: 2, kind: input, shape index: {}]   ;;  %s1014_s3 = inlined_call_operand.vmem [shape: f32[32,14], index: 3, kind: input, shape index: {}]   ;;  %s1015_s4 = inlined_call_operand.vmem [shape: f32[24,14], index: 4, kind: output, shape index: {}]  }
   0x1   :  { %s914_s17 = smov 0  }
   0x2 LB: > { %s923_s18 = sadd.s32 4294967295, %s849_s17   ;;  %s925_s19 = sadd.s32 1, %s849_s17   ;;  %s849_s17 = sphi %s914_s17, %s1019_s17   ;;  %s845_s16 = sphi %s912_s16, %s1018_s16   ;;  %s841_s15 = sphi %s910_s15, %s1017_s15  }
   0x3   : > { %s107_s20 = ssub.s32 %s849_s17, %s925_s19  ;;  %s110_s21 = sadd.s32 1, %s845_s16 }
   0x4   : > { %p108_p0 = scmp.eq.s32.totalorder %s107_s20, 0  ;;  %p120_p1 = scmp.ne.s32.totalorder %s845_s16, %s841_s15 }
   0x5   : > { %p121_p2 = scmp.eq.s32.totalorder %s923_s18, 1  ;;  %p637_p3 = scmp.ge.s32.totalorder %s849_s17, 1 }
   0x6   : > { %s933_s22 = scalar_select %p108_p0, %s845_s16, %s110_s21  }
   0x7   : > { %p935_p4 = por %p121_p2, %p120_p1  ;;  %p171_p5 = scmp.lt.s32.totalorder %s849_s17, 3 }
   0x9   : > { %p172_p6 = pnand %p637_p3, %p171_p5 }
   0xa   : > { %v221_v0 = vld [vmem:[%s1013_s2] sm:$0xff] (!%p172_p6)  ;;  %s943_s26 = sshll.u32 (!%p172_p6), %s923_s18, 1  ;;  %vm222_vm0 = vcmask (!%p172_p6), 64512   ;;  %s883_s6 = smov (!%p172_p6), 24   ;;  %v327_v4 = vld [vmem:[%s1014_s3 + $0x8] sm:$0xff] (!%p172_p6)  ;;  %v328_v6 = vld [vmem:[%s1014_s3 + $0x10] sm:$0xff] (!%p172_p6) }
   0xb   : > { %175 = sbr.rel (%p172_p6) target bundleno = 508 (0x1fc), region = 36  ;;  %677 = vmatprep.subr.mxu0 (!%p172_p6), %v221_v0  ;;  %p205_p7 = scmp.lt.s32.totalorder (!%p172_p6), %s943_s26, 2  ;;  %v326_v3 = vld [vmem:[%s1014_s3] sm:$0xff] (!%p172_p6)  ;;  %v329_v7 = vld [vmem:[%s1014_s3 + $0x18] sm:$0xff] (!%p172_p6)  ;;  %vm323_vm2 = vcmask (!%p172_p6), 195584   ;;  %v884_v18 = vmov (!%p172_p6), 0.0  }
   0xc   : > { %678 = vmatpush3.msra.mxu0 (!%p172_p6), %v221_v0  ;;  %v693_v5 = vpack.c.bf16 (!%p172_p6), %v327_v4, %v326_v3  ;;  %v697_v8 = vpack.c.bf16 (!%p172_p6), %v329_v7, %v328_v6  ;;  %v643_v13 = vld [vmem:[%s1012_s1] ss:$0 sm:$0xff] (!%p172_p6)  ;;  %vm330_vm4 = vcmask (!%p172_p6), 261120   ;;  %s197_s21 = sand.u32 (!%p172_p6), 1, %s841_s15   ;;  %vm412_vm5 = vcmask (!%p172_p6), 113664  }
   0xd   : > { %s638_s24 = sshll.u32 (!%p172_p6), %s197_s21, 4 }
   0xe   : > { %694 = vmatprep.subr.bf16.mxu1 (!%p172_p6), %v693_v5  ;;  %s966_s25 = scalar_lea.vmem (!%p172_p6), [#allocation2], %s638_s24  }
   0xf   : > { %696 = vmatpush3.bf16.msra.mxu1 (!%p172_p6), %v693_v5 }
  0x10   : > { %698 = vmatprep.subr.bf16.mxu1 (!%p172_p6), %v697_v8 }
  0x12   : > { %s206_s27 = scalar_select %p205_p7, %s943_s26, 2 }
  0x13   : > { %700 = vmatpush3.bf16.msra.mxu1 %v697_v8 }
  0x14   : > { %s640_s28 = sshll.u32 %s206_s27, 3  ;;  %s423_s27 = ssub.s32 (%p935_p4), 3, %s943_s26 }
  0x15   : > { %s208_s5 = scalar_lea.vmem %s1011_s0, %s640_s28  ;;  %s665_s28 = sshll.u32 (%p935_p4), %s923_s18, 4 }
  0x16   : > { %v219_v1 = vld [vmem:[%s208_s5] sm:$0xff]  ;;  %v220_v2 = vld [vmem:[%s208_s5 + $0x8] sm:$0xff]  ;;  %p424_p8 = scmp.lt.s32.totalorder (%p935_p4), %s423_s27, 2  ;;  %s977_s30 = scalar_lea.vmem (%p935_p4), %s1015_s4, %s665_s28  }
  0x17   : > { %679 = vmatprep.mubr.msk.f32.mxu0 %vm222_vm0, %v219_v1  ;;  %317 = vrot.lane.b32.xlu0 %v219_v1, %s883_s6 }
  0x18   : > { %680 = vmatmul.mubr.msk.f32.vlgmr.msra.gmra.mrb[0].mxu0 %vm222_vm0, %v220_v2 }
  0x1b   : > { %319 = vrot.lane.b32.xlu0 %v220_v2, %s883_s6 }
  0x89   : > { %v318_v10 = vpop.permute.xlu0 %317 }
  0x8d   : > { %v320_v17 = vpop.permute.xlu0 %319 }
  0xeb   : > { %v681_v9 = vpop.f32.mrb[0].mxu0 }
  0xec   : > { %v703_v11 = vtrunc.f32 %v681_v9  ;;  %v295_v12 = vpop.f32.mrb[1].mxu0 }
  0xed   : > { %v701_v14 = vtrunc.f32 %v295_v12 }
  0xee   : > { %v704_v15 = vcvt.f32.s32 %v703_v11 }
  0xef   : > { %v702_v16 = vcvt.f32.s32 %v701_v14 }
  0xf0   : > { %vm312_vm1 = vcmp.eq.s32.totalorder %v643_v13, %v704_v15 }
  0xf1   : > { %vm311_vm3 = vcmp.eq.s32.totalorder %v643_v13, %v702_v16  ;;  %v645_v19 = vsel %vm312_vm1, 1.0, %v884_v18 }
  0xf2   : > { %v644_v20 = vsel %vm311_vm3, 1.0, %v884_v18  ;;  %v325_v22 = vsel %vm323_vm2, %v645_v19, %v320_v17 }
  0xf3   : > { %v324_v21 = vsel %vm323_vm2, %v644_v20, %v318_v10 }
  0xf4   : > { %690 = vmatprep.mubr.msk.f32.mxu1 %vm330_vm4, %v324_v21 }
  0xf5   : > { %691 = vmatmul.mubr.msk.f32.vlgmr.msra.gmra.mrb[0].mxu1 %vm330_vm4, %v325_v22 }
 0x1c4   : > { %421 = sbr.rel (!%p935_p4) target bundleno = 508 (0x1fc), region = 40 }
 0x1c8   : > { %v692_v23 = vpop.f32.mrb[0].mxu1 }
 0x1c9   : > { %414 = vst.msk [vmem:[%s966_s25 + $0x8] sm:$0xff] %vm412_vm5, %v692_v23  ;;  %v403_v24 = vpop.f32.mrb[1].mxu1 }
 0x1ca   : > { %413 = vst.msk [vmem:[%s966_s25] sm:$0xff] %vm412_vm5, %v403_v24 }
 0x1cb   : > { %s1021_s27 = smov (!%p424_p8, %s423_s27), 2 }
 0x1cc   : > { %s650_s5 = sshll.u32 %s1021_s27, 7 }
 0x1cd   : > { %p653_p9 = scmp.eq.s32.totalorder %s650_s5, 0 }
 0x1ce   : > { %s983_s6 = sshrl.u32 (!%p653_p9), %s1021_s27, 1 }
 0x1cf   : > { %432 = sbr.rel (%p653_p9) target bundleno = 508 (0x1fc), region = 44  ;;  %p654_p10 = scmp.le.s32.totalorder (!%p653_p9), %s983_s6, 0 }
 0x1d6   : > { %590 = sbr.rel (%p654_p10) target bundleno = 487 (0x1e7), region = 120  ;;  %s851_s18 = smov (!%p654_p10), %s977_s30  }
 0x1d7   : > { %s855_s23 = smov (!%p654_p10), %s966_s25   ;;  %s859_s26 = smov (!%p654_p10), 0  }
 0x1d8   : > { %s863_s7 = smov (!%p654_p10), 0  }
 0x1dd LB: >> { %v496_v25 = vld [vmem:[%s857_s23] sm:$0xff]  ;;  %v498_v26 = vld [vmem:[%s857_s23 + $0x8] sm:$0xff]  ;;  %s500_s8 = sadd.s32 1, %s861_s26  ;;  %s490_s7 = sadd.s32 1, %s865_s7   ;;  %s865_s7 = sphi %s863_s7, %s490_s7   ;;  %s861_s26 = sphi %s859_s26, %s860_s26   ;;  %s857_s23 = sphi %s855_s23, %s505_s23   ;;  %s853_s18 = sphi %s851_s18, %s506_s18  }
 0x1de   : >> { %497 = vst [vmem:[%s853_s18] sm:$0xff] %v496_v25  ;;  %499 = vst [vmem:[%s853_s18 + $0x8] sm:$0xff] %v498_v26  ;;  %p501_p11 = scmp.ge.s32.totalorder %s500_s8, %s983_s6  ;;  %p489_p12 = scmp.ge.s32.totalorder %s490_s7, %s983_s6 }
 0x1e0   : >> { %s1023_s8 = smov (%p501_p11, %s500_s8), 0  ;;  %492 = sbr.rel (!%p489_p12) target bundleno = 477 (0x1dd), region = 126 }
 0x1e1   : >> { %s655_s9 = sshll.u32 %s1023_s8, 4  ;;  %s860_s26 = smov %s1023_s8  }
 0x1e2   : >> { %s505_s23 = scalar_lea.vmem %s966_s25, %s655_s9 [#allocation2]   ;;  %s506_s18 = scalar_lea.vmem %s977_s30, %s655_s9  }
 0x1e7 PF: > { %s993_s10 = sand.u32 1, %s1021_s27   ;;  %s666_s11 = sshll.u32 %s983_s6, 4 }
 0x1e8   : > { %s511_s12 = scalar_lea.vmem %s966_s25, %s666_s11 [#allocation2]   ;;  %s513_s13 = scalar_lea.vmem %s977_s30, %s666_s11  }
 0x1e9   : > { %p660_p13 = scmp.le.s32.totalorder %s993_s10, 0 }
 0x1ea   : > { %s867_s14 = smov (!%p660_p13), %s513_s13   ;;  %s871_s17 = smov (!%p660_p13), %s511_s12  }
 0x1eb   : > { %604 = sbr.rel (%p660_p13) target bundleno = 508 (0x1fc), region = 131  ;;  %s875_s20 = smov (!%p660_p13), 0  }
 0x1ec   : > { %s879_s21 = smov (!%p660_p13), 0  }
 0x1f2 LB: >> { %v523_v27 = vld [vmem:[%s873_s17] sm:$0xff]  ;;  %s525_s24 = sadd.s32 1, %s877_s20  ;;  %s517_s21 = sadd.s32 1, %s881_s21   ;;  %s881_s21 = sphi %s879_s21, %s517_s21   ;;  %s877_s20 = sphi %s875_s20, %s876_s20   ;;  %s873_s17 = sphi %s871_s17, %s530_s17   ;;  %s869_s14 = sphi %s867_s14, %s531_s14  }
 0x1f3   : >> { %524 = vst [vmem:[%s869_s14] sm:$0xff] %v523_v27  ;;  %p526_p0 = scmp.ge.s32.totalorder %s525_s24, %s993_s10  ;;  %p516_p1 = scmp.ge.s32.totalorder %s517_s21, %s993_s10 }
 0x1f5   : >> { %s1025_s24 = smov (%p526_p0, %s525_s24), 0  ;;  %519 = sbr.rel (!%p516_p1) target bundleno = 498 (0x1f2), region = 137 }
 0x1f6   : >> { %s661_s25 = sshll.u32 %s1025_s24, 3  ;;  %s876_s20 = smov %s1025_s24  }
 0x1f7   : >> { %s530_s17 = scalar_lea.vmem %s511_s12, %s661_s25 [#allocation2]   ;;  %s531_s14 = scalar_lea.vmem %s513_s13, %s661_s25  }
 0x1fc PF: > { %p11_p2 = scmp.ge.s32.totalorder %s925_s19, 4   ;;  %s1017_s15 = smov %s845_s16 }
 0x1fd   : > { %s1018_s16 = smov %s933_s22  ;;  %s1019_s17 = smov %s925_s19 }
 0x1fe   :  { %13 = sbr.rel (!%p11_p2) target bundleno = 2 (0x2), region = 148 }

</bundles_post_ra>
